<compile_context>
chip_gen: v7x
topology: tpu7x:2x2x1
jax: 0.10.0
libtpu: 0.0.40
codegen_flags: <defaults>
</compile_context>

<pallas_src>
import functools

import jax
import jax.numpy as jnp
from jax.experimental import pallas as pl
from jax.experimental.pallas import tpu as pltpu


def lstm_fc_kernel(x_ref, w_ih_ref, w_hh_ref, b_ref, w_fc_ref, b_fc_ref, out_ref):
    """Whole-sequence LSTM + final Linear in a single invocation.

    x_ref:    (B, T, I)   f32 input, batch-major (no wrapper transpose)
    w_ih_ref: (I, 4H)     input->gate weights, columns reordered (i, f, o, g)
    w_hh_ref: (H, 4H)     hidden->gate weights, columns reordered (i, f, o, g)
    b_ref:    (1, 4H)     combined bias b_ih + b_hh, reordered (i, f, o, g)
    w_fc_ref: (H, Opad)   final linear weights (transposed, zero-padded to 128 lanes)
    b_fc_ref: (1, Opad)   final linear bias (zero-padded)
    out_ref:  (B, Opad)   f32 output (lane-dense store)
    """
    B, T, _ = x_ref.shape
    H = w_hh_ref.shape[0]

    w_ih = w_ih_ref[...]
    w_hh = w_hh_ref[...]          # loaded once, reused across all timesteps

    # Hoisted input projection (off the serial recurrent path): one (T, I) x (I, 4H)
    # MXU matmul per batch row; stacked time-major ONCE so the per-step read is a
    # cheap static leading-dim index.  Bias broadcast is also done once here.
    gx = [jnp.dot(x_ref[b], w_ih, preferred_element_type=jnp.float32)
          for b in range(B)]                              # B x (T, 4H)
    gates_x = jnp.stack(gx, axis=1) + b_ref[...]          # (T, B, 4H) f32

    # Recurrent state stays in vregs (f32).
    h = jnp.zeros((B, H), jnp.float32)
    c = jnp.zeros((B, H), jnp.float32)

    # Statically unrolled recurrence (T is small); only h @ W_hh is on the serial path.
    # TODO(synk): large-T variant -> lax.fori_loop over a VMEM gates scratch + explicit
    # MXU weight staging (pltpu.matmul_push_rhs / matmul_acc_lhs / matmul_pop).
    for t in range(T):
        g = gates_x[t] + jnp.dot(h, w_hh, preferred_element_type=jnp.float32)
        # Gate layout is (i, f, o, g): one sigmoid over the contiguous 3H block and one
        # tanh over the last H block -- 2 EUP pushes per step instead of 4.
        s = jax.nn.sigmoid(g[:, :3 * H])
        g_cand = jnp.tanh(g[:, 3 * H:])
        i_g = s[:, 0 * H:1 * H]
        f_g = s[:, 1 * H:2 * H]
        o_g = s[:, 2 * H:3 * H]
        c = f_g * c + i_g * g_cand
        h = o_g * jnp.tanh(c)

    # Final FC on the last hidden state; padded columns keep the store lane-dense.
    out_ref[...] = (jnp.dot(h, w_fc_ref[...], preferred_element_type=jnp.float32)
                    + b_fc_ref[...]).astype(out_ref.dtype)


def prepare_params(w_ih_t, w_hh_t, b_ih, b_hh, w_fc_t, b_fc):
    """One-time weight preparation (call at model init, NOT per forward):
       gate-column reorder (i,f,g,o)->(i,f,o,g), bias combine, FC 128-lane zero pad."""
    H = w_hh_t.shape[0]

    def reorder(w):  # columns (i, f, g, o) -> (i, f, o, g)
        i, f, g, o = (w[..., 0 * H:1 * H], w[..., 1 * H:2 * H],
                      w[..., 2 * H:3 * H], w[..., 3 * H:4 * H])
        return jnp.concatenate([i, f, o, g], axis=-1)

    w_ih_r = reorder(w_ih_t).astype(jnp.float32)
    w_hh_r = reorder(w_hh_t).astype(jnp.float32)
    b_r = reorder((b_ih + b_hh).reshape(1, 4 * H)).astype(jnp.float32)

    O = w_fc_t.shape[1]
    O_pad = ((O + 127) // 128) * 128
    w_fc_pad = jnp.zeros((H, O_pad), jnp.float32).at[:, :O].set(
        w_fc_t.astype(jnp.float32))
    b_fc_pad = jnp.zeros((1, O_pad), jnp.float32).at[:, :O].set(
        b_fc.reshape(1, O).astype(jnp.float32))
    return w_ih_r, w_hh_r, b_r, w_fc_pad, b_fc_pad


@functools.partial(jax.jit, static_argnames=("output_size",))
def lstm_net_forward(x, w_ih_r, w_hh_r, b_r, w_fc_pad, b_fc_pad, *, output_size):
    """x: (B, T, I) float32 -> (B, output_size) float32"""
    B = x.shape[0]
    O_pad = w_fc_pad.shape[1]
    vmem = pl.BlockSpec(memory_space=pltpu.MemorySpace.VMEM)

    out_pad = pl.pallas_call(
        lstm_fc_kernel,
        out_shape=jax.ShapeDtypeStruct((B, O_pad), jnp.float32),
        in_specs=[vmem] * 6,
        out_specs=vmem,
        compiler_params=pltpu.CompilerParams(vmem_limit_bytes=32 * 1024 * 1024),
    )(x.astype(jnp.float32), w_ih_r, w_hh_r, b_r, w_fc_pad, b_fc_pad)

    return out_pad[:, :output_size]


def reference_forward(x, w_ih_t, w_hh_t, b_ih, b_hh, w_fc_t, b_fc):
    """Pure-JAX f32 reference matching torch.nn.LSTM(batch_first=True) + Linear,
    using the ORIGINAL (i, f, g, o) gate order and un-prepared weights."""
    B, T, _ = x.shape
    H = w_hh_t.shape[0]
    b = (b_ih + b_hh).reshape(1, 4 * H)

    def step(carry, x_t):
        h, c = carry
        g = x_t @ w_ih_t + h @ w_hh_t + b
        i_g = jax.nn.sigmoid(g[:, 0 * H:1 * H])
        f_g = jax.nn.sigmoid(g[:, 1 * H:2 * H])
        g_g = jnp.tanh(g[:, 2 * H:3 * H])
        o_g = jax.nn.sigmoid(g[:, 3 * H:4 * H])
        c = f_g * c + i_g * g_g
        h = o_g * jnp.tanh(c)
        return (h, c), None

    h0 = jnp.zeros((B, H), jnp.float32)
    c0 = jnp.zeros((B, H), jnp.float32)
    (h_last, _), _ = jax.lax.scan(step, (h0, c0), jnp.transpose(x, (1, 0, 2)))
    return h_last @ w_fc_t + b_fc


if __name__ == "__main__":
    B, T = 2, 8
    input_size, hidden_size, output_size = 16, 32, 8

    key = jax.random.PRNGKey(0)
    keys = jax.random.split(key, 7)
    scale = 1.0 / jnp.sqrt(hidden_size)

    # PyTorch param shapes: weight_ih (4H, I), weight_hh (4H, H), biases (4H,).
    # Stored transposed here for right-multiplication.
    w_ih_t = jax.random.uniform(keys[0], (input_size, 4 * hidden_size),
                                jnp.float32, -scale, scale)
    w_hh_t = jax.random.uniform(keys[1], (hidden_size, 4 * hidden_size),
                                jnp.float32, -scale, scale)
    b_ih = jax.random.uniform(keys[2], (4 * hidden_size,), jnp.float32, -scale, scale)
    b_hh = jax.random.uniform(keys[3], (4 * hidden_size,), jnp.float32, -scale, scale)
    w_fc_t = jax.random.uniform(keys[4], (hidden_size, output_size),
                                jnp.float32, -scale, scale)
    b_fc = jax.random.uniform(keys[5], (output_size,), jnp.float32, -scale, scale)
    x = jax.random.normal(keys[6], (B, T, input_size), jnp.float32)

    # One-time weight prep, outside the per-call hot path.
    params = prepare_params(w_ih_t, w_hh_t, b_ih, b_hh, w_fc_t, b_fc)
    params = jax.tree_util.tree_map(jax.block_until_ready, params)

    out = lstm_net_forward(x, *params, output_size=output_size)
    out = jax.block_until_ready(out)

    ref = reference_forward(x, w_ih_t, w_hh_t, b_ih, b_hh, w_fc_t, b_fc)
    assert out.shape == (B, output_size)
    assert jnp.allclose(out, ref, atol=1e-4, rtol=1e-4), \
        float(jnp.max(jnp.abs(out - ref)))

    print("KERNEL_OK")
</pallas_src>

<mosaic_0001>
module attributes {stable_mosaic.version = 11 : i64} {
  func.func @lstm_fc_kernel(%arg0: memref<2x8x16xf32, #tpu.memory_space<vmem>>, %arg1: memref<16x128xf32, #tpu.memory_space<vmem>>, %arg2: memref<32x128xf32, #tpu.memory_space<vmem>>, %arg3: memref<1x128xf32, #tpu.memory_space<vmem>>, %arg4: memref<32x128xf32, #tpu.memory_space<vmem>>, %arg5: memref<1x128xf32, #tpu.memory_space<vmem>>, %arg6: memref<2x128xf32, #tpu.memory_space<vmem>>) attributes {dimension_semantics = [], scalar_prefetch = 0 : i64, scratch_operands = 0 : i64, tpu.core_type = #tpu.core_type<tc>} {
    %c0 = arith.constant 0 : index
    %c0_0 = arith.constant 0 : index
    %0 = vector.load %arg1[%c0, %c0_0] : memref<16x128xf32, #tpu.memory_space<vmem>>, vector<16x128xf32>
    %c0_1 = arith.constant 0 : index
    %c0_2 = arith.constant 0 : index
    %1 = vector.load %arg2[%c0_1, %c0_2] : memref<32x128xf32, #tpu.memory_space<vmem>>, vector<32x128xf32>
    %c0_3 = arith.constant 0 : index
    %c0_4 = arith.constant 0 : index
    %c0_5 = arith.constant 0 : index
    %2 = vector.load %arg0[%c0_3, %c0_4, %c0_5] : memref<2x8x16xf32, #tpu.memory_space<vmem>>, vector<1x8x16xf32>
    %3 = vector.shape_cast %2 : vector<1x8x16xf32> to vector<8x16xf32>
    %cst = arith.constant dense<0.000000e+00> : vector<8x128xf32>
    %4 = tpu.matmul %3, %0, %cst {dimension_numbers = #tpu.dot_dimension_numbers<[1], [0], [0], [1], [0, 0, 1, 1], [], []>} : vector<8x16xf32>, vector<16x128xf32>, vector<8x128xf32> -> vector<8x128xf32>
    %c1 = arith.constant 1 : index
    %c0_6 = arith.constant 0 : index
    %c0_7 = arith.constant 0 : index
    %5 = vector.load %arg0[%c1, %c0_6, %c0_7] : memref<2x8x16xf32, #tpu.memory_space<vmem>>, vector<1x8x16xf32>
    %6 = vector.shape_cast %5 : vector<1x8x16xf32> to vector<8x16xf32>
    %cst_8 = arith.constant dense<0.000000e+00> : vector<8x128xf32>
    %7 = tpu.matmul %6, %0, %cst_8 {dimension_numbers = #tpu.dot_dimension_numbers<[1], [0], [0], [1], [0, 0, 1, 1], [], []>} : vector<8x16xf32>, vector<16x128xf32>, vector<8x128xf32> -> vector<8x128xf32>
    %8 = vector.shape_cast %4 : vector<8x128xf32> to vector<8x1x128xf32>
    %9 = vector.shape_cast %7 : vector<8x128xf32> to vector<8x1x128xf32>
    %10 = tpu.concatenate %8, %9 in 1 : vector<8x1x128xf32>, vector<8x1x128xf32> -> vector<8x2x128xf32>
    %c0_9 = arith.constant 0 : index
    %c0_10 = arith.constant 0 : index
    %11 = vector.load %arg3[%c0_9, %c0_10] : memref<1x128xf32, #tpu.memory_space<vmem>>, vector<1x128xf32>
    %12 = vector.shape_cast %11 : vector<1x128xf32> to vector<1x1x128xf32>
    %13 = vector.broadcast %12 : vector<1x1x128xf32> to vector<8x2x128xf32>
    %14 = arith.addf %10, %13 : vector<8x2x128xf32>
    %cst_11 = arith.constant 0.000000e+00 : f32
    %15 = vector.broadcast %cst_11 : f32 to vector<2x32xf32>
    %cst_12 = arith.constant 0.000000e+00 : f32
    %16 = vector.broadcast %cst_12 : f32 to vector<2x32xf32>
    %17 = vector.extract_strided_slice %14 {offsets = [0, 0, 0], sizes = [1, 2, 128], strides = [1, 1, 1]} : vector<8x2x128xf32> to vector<1x2x128xf32>
    %18 = vector.shape_cast %17 : vector<1x2x128xf32> to vector<2x128xf32>
    %cst_13 = arith.constant dense<0.000000e+00> : vector<2x128xf32>
    %19 = tpu.matmul %15, %1, %cst_13 {dimension_numbers = #tpu.dot_dimension_numbers<[1], [0], [0], [1], [0, 0, 1, 1], [], []>} : vector<2x32xf32>, vector<32x128xf32>, vector<2x128xf32> -> vector<2x128xf32>
    %20 = arith.addf %18, %19 : vector<2x128xf32>
    %21 = vector.extract_strided_slice %20 {offsets = [0, 0], sizes = [2, 96], strides = [1, 1]} : vector<2x128xf32> to vector<2x96xf32>
    %22 = arith.negf %21 : vector<2x96xf32>
    %23 = math.exp %22 : vector<2x96xf32>
    %cst_14 = arith.constant 1.000000e+00 : f32
    %24 = vector.broadcast %cst_14 : f32 to vector<2x96xf32>
    %25 = arith.addf %24, %23 : vector<2x96xf32>
    %26 = arith.divf %24, %25 : vector<2x96xf32>
    %27 = vector.extract_strided_slice %20 {offsets = [0, 96], sizes = [2, 32], strides = [1, 1]} : vector<2x128xf32> to vector<2x32xf32>
    %28 = math.tanh %27 : vector<2x32xf32>
    %29 = vector.extract_strided_slice %26 {offsets = [0, 0], sizes = [2, 32], strides = [1, 1]} : vector<2x96xf32> to vector<2x32xf32>
    %30 = vector.extract_strided_slice %26 {offsets = [0, 32], sizes = [2, 32], strides = [1, 1]} : vector<2x96xf32> to vector<2x32xf32>
    %31 = vector.extract_strided_slice %26 {offsets = [0, 64], sizes = [2, 32], strides = [1, 1]} : vector<2x96xf32> to vector<2x32xf32>
    %32 = arith.mulf %30, %16 : vector<2x32xf32>
    %33 = arith.mulf %29, %28 : vector<2x32xf32>
    %34 = arith.addf %32, %33 : vector<2x32xf32>
    %35 = math.tanh %34 : vector<2x32xf32>
    %36 = arith.mulf %31, %35 : vector<2x32xf32>
    %37 = vector.extract_strided_slice %14 {offsets = [1, 0, 0], sizes = [1, 2, 128], strides = [1, 1, 1]} : vector<8x2x128xf32> to vector<1x2x128xf32>
    %38 = vector.shape_cast %37 : vector<1x2x128xf32> to vector<2x128xf32>
    %cst_15 = arith.constant dense<0.000000e+00> : vector<2x128xf32>
    %39 = tpu.matmul %36, %1, %cst_15 {dimension_numbers = #tpu.dot_dimension_numbers<[1], [0], [0], [1], [0, 0, 1, 1], [], []>} : vector<2x32xf32>, vector<32x128xf32>, vector<2x128xf32> -> vector<2x128xf32>
    %40 = arith.addf %38, %39 : vector<2x128xf32>
    %41 = vector.extract_strided_slice %40 {offsets = [0, 0], sizes = [2, 96], strides = [1, 1]} : vector<2x128xf32> to vector<2x96xf32>
    %42 = arith.negf %41 : vector<2x96xf32>
    %43 = math.exp %42 : vector<2x96xf32>
    %cst_16 = arith.constant 1.000000e+00 : f32
    %44 = vector.broadcast %cst_16 : f32 to vector<2x96xf32>
    %45 = arith.addf %44, %43 : vector<2x96xf32>
    %46 = arith.divf %44, %45 : vector<2x96xf32>
    %47 = vector.extract_strided_slice %40 {offsets = [0, 96], sizes = [2, 32], strides = [1, 1]} : vector<2x128xf32> to vector<2x32xf32>
    %48 = math.tanh %47 : vector<2x32xf32>
    %49 = vector.extract_strided_slice %46 {offsets = [0, 0], sizes = [2, 32], strides = [1, 1]} : vector<2x96xf32> to vector<2x32xf32>
    %50 = vector.extract_strided_slice %46 {offsets = [0, 32], sizes = [2, 32], strides = [1, 1]} : vector<2x96xf32> to vector<2x32xf32>
    %51 = vector.extract_strided_slice %46 {offsets = [0, 64], sizes = [2, 32], strides = [1, 1]} : vector<2x96xf32> to vector<2x32xf32>
    %52 = arith.mulf %50, %34 : vector<2x32xf32>
    %53 = arith.mulf %49, %48 : vector<2x32xf32>
    %54 = arith.addf %52, %53 : vector<2x32xf32>
    %55 = math.tanh %54 : vector<2x32xf32>
    %56 = arith.mulf %51, %55 : vector<2x32xf32>
    %57 = vector.extract_strided_slice %14 {offsets = [2, 0, 0], sizes = [1, 2, 128], strides = [1, 1, 1]} : vector<8x2x128xf32> to vector<1x2x128xf32>
    %58 = vector.shape_cast %57 : vector<1x2x128xf32> to vector<2x128xf32>
    %cst_17 = arith.constant dense<0.000000e+00> : vector<2x128xf32>
    %59 = tpu.matmul %56, %1, %cst_17 {dimension_numbers = #tpu.dot_dimension_numbers<[1], [0], [0], [1], [0, 0, 1, 1], [], []>} : vector<2x32xf32>, vector<32x128xf32>, vector<2x128xf32> -> vector<2x128xf32>
    %60 = arith.addf %58, %59 : vector<2x128xf32>
    %61 = vector.extract_strided_slice %60 {offsets = [0, 0], sizes = [2, 96], strides = [1, 1]} : vector<2x128xf32> to vector<2x96xf32>
    %62 = arith.negf %61 : vector<2x96xf32>
    %63 = math.exp %62 : vector<2x96xf32>
    %cst_18 = arith.constant 1.000000e+00 : f32
    %64 = vector.broadcast %cst_18 : f32 to vector<2x96xf32>
    %65 = arith.addf %64, %63 : vector<2x96xf32>
    %66 = arith.divf %64, %65 : vector<2x96xf32>
    %67 = vector.extract_strided_slice %60 {offsets = [0, 96], sizes = [2, 32], strides = [1, 1]} : vector<2x128xf32> to vector<2x32xf32>
    %68 = math.tanh %67 : vector<2x32xf32>
    %69 = vector.extract_strided_slice %66 {offsets = [0, 0], sizes = [2, 32], strides = [1, 1]} : vector<2x96xf32> to vector<2x32xf32>
    %70 = vector.extract_strided_slice %66 {offsets = [0, 32], sizes = [2, 32], strides = [1, 1]} : vector<2x96xf32> to vector<2x32xf32>
    %71 = vector.extract_strided_slice %66 {offsets = [0, 64], sizes = [2, 32], strides = [1, 1]} : vector<2x96xf32> to vector<2x32xf32>
    %72 = arith.mulf %70, %54 : vector<2x32xf32>
    %73 = arith.mulf %69, %68 : vector<2x32xf32>
    %74 = arith.addf %72, %73 : vector<2x32xf32>
    %75 = math.tanh %74 : vector<2x32xf32>
    %76 = arith.mulf %71, %75 : vector<2x32xf32>
    %77 = vector.extract_strided_slice %14 {offsets = [3, 0, 0], sizes = [1, 2, 128], strides = [1, 1, 1]} : vector<8x2x128xf32> to vector<1x2x128xf32>
    %78 = vector.shape_cast %77 : vector<1x2x128xf32> to vector<2x128xf32>
    %cst_19 = arith.constant dense<0.000000e+00> : vector<2x128xf32>
    %79 = tpu.matmul %76, %1, %cst_19 {dimension_numbers = #tpu.dot_dimension_numbers<[1], [0], [0], [1], [0, 0, 1, 1], [], []>} : vector<2x32xf32>, vector<32x128xf32>, vector<2x128xf32> -> vector<2x128xf32>
    %80 = arith.addf %78, %79 : vector<2x128xf32>
    %81 = vector.extract_strided_slice %80 {offsets = [0, 0], sizes = [2, 96], strides = [1, 1]} : vector<2x128xf32> to vector<2x96xf32>
    %82 = arith.negf %81 : vector<2x96xf32>
    %83 = math.exp %82 : vector<2x96xf32>
    %cst_20 = arith.constant 1.000000e+00 : f32
    %84 = vector.broadcast %cst_20 : f32 to vector<2x96xf32>
    %85 = arith.addf %84, %83 : vector<2x96xf32>
    %86 = arith.divf %84, %85 : vector<2x96xf32>
    %87 = vector.extract_strided_slice %80 {offsets = [0, 96], sizes = [2, 32], strides = [1, 1]} : vector<2x128xf32> to vector<2x32xf32>
    %88 = math.tanh %87 : vector<2x32xf32>
    %89 = vector.extract_strided_slice %86 {offsets = [0, 0], sizes = [2, 32], strides = [1, 1]} : vector<2x96xf32> to vector<2x32xf32>
    %90 = vector.extract_strided_slice %86 {offsets = [0, 32], sizes = [2, 32], strides = [1, 1]} : vector<2x96xf32> to vector<2x32xf32>
    %91 = vector.extract_strided_slice %86 {offsets = [0, 64], sizes = [2, 32], strides = [1, 1]} : vector<2x96xf32> to vector<2x32xf32>
    %92 = arith.mulf %90, %74 : vector<2x32xf32>
    %93 = arith.mulf %89, %88 : vector<2x32xf32>
    %94 = arith.addf %92, %93 : vector<2x32xf32>
    %95 = math.tanh %94 : vector<2x32xf32>
    %96 = arith.mulf %91, %95 : vector<2x32xf32>
    %97 = vector.extract_strided_slice %14 {offsets = [4, 0, 0], sizes = [1, 2, 128], strides = [1, 1, 1]} : vector<8x2x128xf32> to vector<1x2x128xf32>
    %98 = vector.shape_cast %97 : vector<1x2x128xf32> to vector<2x128xf32>
    %cst_21 = arith.constant dense<0.000000e+00> : vector<2x128xf32>
    %99 = tpu.matmul %96, %1, %cst_21 {dimension_numbers = #tpu.dot_dimension_numbers<[1], [0], [0], [1], [0, 0, 1, 1], [], []>} : vector<2x32xf32>, vector<32x128xf32>, vector<2x128xf32> -> vector<2x128xf32>
    %100 = arith.addf %98, %99 : vector<2x128xf32>
    %101 = vector.extract_strided_slice %100 {offsets = [0, 0], sizes = [2, 96], strides = [1, 1]} : vector<2x128xf32> to vector<2x96xf32>
    %102 = arith.negf %101 : vector<2x96xf32>
    %103 = math.exp %102 : vector<2x96xf32>
    %cst_22 = arith.constant 1.000000e+00 : f32
    %104 = vector.broadcast %cst_22 : f32 to vector<2x96xf32>
    %105 = arith.addf %104, %103 : vector<2x96xf32>
    %106 = arith.divf %104, %105 : vector<2x96xf32>
    %107 = vector.extract_strided_slice %100 {offsets = [0, 96], sizes = [2, 32], strides = [1, 1]} : vector<2x128xf32> to vector<2x32xf32>
    %108 = math.tanh %107 : vector<2x32xf32>
    %109 = vector.extract_strided_slice %106 {offsets = [0, 0], sizes = [2, 32], strides = [1, 1]} : vector<2x96xf32> to vector<2x32xf32>
    %110 = vector.extract_strided_slice %106 {offsets = [0, 32], sizes = [2, 32], strides = [1, 1]} : vector<2x96xf32> to vector<2x32xf32>
    %111 = vector.extract_strided_slice %106 {offsets = [0, 64], sizes = [2, 32], strides = [1, 1]} : vector<2x96xf32> to vector<2x32xf32>
    %112 = arith.mulf %110, %94 : vector<2x32xf32>
    %113 = arith.mulf %109, %108 : vector<2x32xf32>
    %114 = arith.addf %112, %113 : vector<2x32xf32>
    %115 = math.tanh %114 : vector<2x32xf32>
    %116 = arith.mulf %111, %115 : vector<2x32xf32>
    %117 = vector.extract_strided_slice %14 {offsets = [5, 0, 0], sizes = [1, 2, 128], strides = [1, 1, 1]} : vector<8x2x128xf32> to vector<1x2x128xf32>
    %118 = vector.shape_cast %117 : vector<1x2x128xf32> to vector<2x128xf32>
    %cst_23 = arith.constant dense<0.000000e+00> : vector<2x128xf32>
    %119 = tpu.matmul %116, %1, %cst_23 {dimension_numbers = #tpu.dot_dimension_numbers<[1], [0], [0], [1], [0, 0, 1, 1], [], []>} : vector<2x32xf32>, vector<32x128xf32>, vector<2x128xf32> -> vector<2x128xf32>
    %120 = arith.addf %118, %119 : vector<2x128xf32>
    %121 = vector.extract_strided_slice %120 {offsets = [0, 0], sizes = [2, 96], strides = [1, 1]} : vector<2x128xf32> to vector<2x96xf32>
    %122 = arith.negf %121 : vector<2x96xf32>
    %123 = math.exp %122 : vector<2x96xf32>
    %cst_24 = arith.constant 1.000000e+00 : f32
    %124 = vector.broadcast %cst_24 : f32 to vector<2x96xf32>
    %125 = arith.addf %124, %123 : vector<2x96xf32>
    %126 = arith.divf %124, %125 : vector<2x96xf32>
    %127 = vector.extract_strided_slice %120 {offsets = [0, 96], sizes = [2, 32], strides = [1, 1]} : vector<2x128xf32> to vector<2x32xf32>
    %128 = math.tanh %127 : vector<2x32xf32>
    %129 = vector.extract_strided_slice %126 {offsets = [0, 0], sizes = [2, 32], strides = [1, 1]} : vector<2x96xf32> to vector<2x32xf32>
    %130 = vector.extract_strided_slice %126 {offsets = [0, 32], sizes = [2, 32], strides = [1, 1]} : vector<2x96xf32> to vector<2x32xf32>
    %131 = vector.extract_strided_slice %126 {offsets = [0, 64], sizes = [2, 32], strides = [1, 1]} : vector<2x96xf32> to vector<2x32xf32>
    %132 = arith.mulf %130, %114 : vector<2x32xf32>
    %133 = arith.mulf %129, %128 : vector<2x32xf32>
    %134 = arith.addf %132, %133 : vector<2x32xf32>
    %135 = math.tanh %134 : vector<2x32xf32>
    %136 = arith.mulf %131, %135 : vector<2x32xf32>
    %137 = vector.extract_strided_slice %14 {offsets = [6, 0, 0], sizes = [1, 2, 128], strides = [1, 1, 1]} : vector<8x2x128xf32> to vector<1x2x128xf32>
    %138 = vector.shape_cast %137 : vector<1x2x128xf32> to vector<2x128xf32>
    %cst_25 = arith.constant dense<0.000000e+00> : vector<2x128xf32>
    %139 = tpu.matmul %136, %1, %cst_25 {dimension_numbers = #tpu.dot_dimension_numbers<[1], [0], [0], [1], [0, 0, 1, 1], [], []>} : vector<2x32xf32>, vector<32x128xf32>, vector<2x128xf32> -> vector<2x128xf32>
    %140 = arith.addf %138, %139 : vector<2x128xf32>
    %141 = vector.extract_strided_slice %140 {offsets = [0, 0], sizes = [2, 96], strides = [1, 1]} : vector<2x128xf32> to vector<2x96xf32>
    %142 = arith.negf %141 : vector<2x96xf32>
    %143 = math.exp %142 : vector<2x96xf32>
    %cst_26 = arith.constant 1.000000e+00 : f32
    %144 = vector.broadcast %cst_26 : f32 to vector<2x96xf32>
    %145 = arith.addf %144, %143 : vector<2x96xf32>
    %146 = arith.divf %144, %145 : vector<2x96xf32>
    %147 = vector.extract_strided_slice %140 {offsets = [0, 96], sizes = [2, 32], strides = [1, 1]} : vector<2x128xf32> to vector<2x32xf32>
    %148 = math.tanh %147 : vector<2x32xf32>
    %149 = vector.extract_strided_slice %146 {offsets = [0, 0], sizes = [2, 32], strides = [1, 1]} : vector<2x96xf32> to vector<2x32xf32>
    %150 = vector.extract_strided_slice %146 {offsets = [0, 32], sizes = [2, 32], strides = [1, 1]} : vector<2x96xf32> to vector<2x32xf32>
    %151 = vector.extract_strided_slice %146 {offsets = [0, 64], sizes = [2, 32], strides = [1, 1]} : vector<2x96xf32> to vector<2x32xf32>
    %152 = arith.mulf %150, %134 : vector<2x32xf32>
    %153 = arith.mulf %149, %148 : vector<2x32xf32>
    %154 = arith.addf %152, %153 : vector<2x32xf32>
    %155 = math.tanh %154 : vector<2x32xf32>
    %156 = arith.mulf %151, %155 : vector<2x32xf32>
    %157 = vector.extract_strided_slice %14 {offsets = [7, 0, 0], sizes = [1, 2, 128], strides = [1, 1, 1]} : vector<8x2x128xf32> to vector<1x2x128xf32>
    %158 = vector.shape_cast %157 : vector<1x2x128xf32> to vector<2x128xf32>
    %cst_27 = arith.constant dense<0.000000e+00> : vector<2x128xf32>
    %159 = tpu.matmul %156, %1, %cst_27 {dimension_numbers = #tpu.dot_dimension_numbers<[1], [0], [0], [1], [0, 0, 1, 1], [], []>} : vector<2x32xf32>, vector<32x128xf32>, vector<2x128xf32> -> vector<2x128xf32>
    %160 = arith.addf %158, %159 : vector<2x128xf32>
    %161 = vector.extract_strided_slice %160 {offsets = [0, 0], sizes = [2, 96], strides = [1, 1]} : vector<2x128xf32> to vector<2x96xf32>
    %162 = arith.negf %161 : vector<2x96xf32>
    %163 = math.exp %162 : vector<2x96xf32>
    %cst_28 = arith.constant 1.000000e+00 : f32
    %164 = vector.broadcast %cst_28 : f32 to vector<2x96xf32>
    %165 = arith.addf %164, %163 : vector<2x96xf32>
    %166 = arith.divf %164, %165 : vector<2x96xf32>
    %167 = vector.extract_strided_slice %160 {offsets = [0, 96], sizes = [2, 32], strides = [1, 1]} : vector<2x128xf32> to vector<2x32xf32>
    %168 = math.tanh %167 : vector<2x32xf32>
    %169 = vector.extract_strided_slice %166 {offsets = [0, 0], sizes = [2, 32], strides = [1, 1]} : vector<2x96xf32> to vector<2x32xf32>
    %170 = vector.extract_strided_slice %166 {offsets = [0, 32], sizes = [2, 32], strides = [1, 1]} : vector<2x96xf32> to vector<2x32xf32>
    %171 = vector.extract_strided_slice %166 {offsets = [0, 64], sizes = [2, 32], strides = [1, 1]} : vector<2x96xf32> to vector<2x32xf32>
    %172 = arith.mulf %170, %154 : vector<2x32xf32>
    %173 = arith.mulf %169, %168 : vector<2x32xf32>
    %174 = arith.addf %172, %173 : vector<2x32xf32>
    %175 = math.tanh %174 : vector<2x32xf32>
    %176 = arith.mulf %171, %175 : vector<2x32xf32>
    %c0_29 = arith.constant 0 : index
    %c0_30 = arith.constant 0 : index
    %177 = vector.load %arg4[%c0_29, %c0_30] : memref<32x128xf32, #tpu.memory_space<vmem>>, vector<32x128xf32>
    %cst_31 = arith.constant dense<0.000000e+00> : vector<2x128xf32>
    %178 = tpu.matmul %176, %177, %cst_31 {dimension_numbers = #tpu.dot_dimension_numbers<[1], [0], [0], [1], [0, 0, 1, 1], [], []>} : vector<2x32xf32>, vector<32x128xf32>, vector<2x128xf32> -> vector<2x128xf32>
    %c0_32 = arith.constant 0 : index
    %c0_33 = arith.constant 0 : index
    %179 = vector.load %arg5[%c0_32, %c0_33] : memref<1x128xf32, #tpu.memory_space<vmem>>, vector<1x128xf32>
    %180 = vector.broadcast %179 : vector<1x128xf32> to vector<2x128xf32>
    %181 = arith.addf %178, %180 : vector<2x128xf32>
    %c0_34 = arith.constant 0 : index
    %c0_35 = arith.constant 0 : index
    %182 = vector.load %arg6[%c0_34, %c0_35] : memref<2x128xf32, #tpu.memory_space<vmem>>, vector<2x128xf32>
    tpu.vector_store %arg6[%c0_34, %c0_35], %181 {strides = array<i32>} : memref<2x128xf32, #tpu.memory_space<vmem>>, vector<2x128xf32>,
    return
  }
}

</mosaic_0001>

<bundles_post_ra>
// kernel: lstm_net_forward.1
= control target key start
LH: loop header
LB: loop body
LE: loop exit
PB: predicated region body
PF: predicated region fallthrough
CT: control target
= control target key end

     0   :  { %11 = vsyncpa [#allocation3], 0  ;;  %s2018_s0 = inlined_call_operand.hbm [shape: f32[2,8,16], index: 0, kind: input, shape index: {}]   ;;  %s2019_s1 = inlined_call_operand.hbm [shape: f32[16,128], index: 1, kind: input, shape index: {}]   ;;  %s2020_s2 = inlined_call_operand.hbm [shape: f32[32,128], index: 2, kind: input, shape index: {}]   ;;  %s2021_s3 = inlined_call_operand.vmem [shape: f32[1,128], index: 3, kind: input, shape index: {}]   ;;  %s2022_s4 = inlined_call_operand.hbm [shape: f32[32,128], index: 4, kind: input, shape index: {}]   ;;  %s2023_s5 = inlined_call_operand.vmem [shape: f32[1,128], index: 5, kind: input, shape index: {}]   ;;  %s2024_s6 = inlined_call_operand.hbm [shape: f32[2,128], index: 6, kind: output, shape index: {}]  }
   0x1   :  { %12 = vsyncpa [#allocation6], 0 }
   0x2   :  { %13 = vsyncpa [#allocation9], 0 }
   0x3   :  { %14 = vsyncpa [#allocation4], 0  ;;  %s1749_s21 = smov [#allocation5]   ;;  %s1750_s23 = smov [#allocation2]  }
   0x4   :  { %s32_s22 = sshll.u32 %s1749_s21, 4  ;;  %s20_s24 = sshll.u32 %s1750_s23, 4  ;;  %s33_s22 = int_to_ptr.vmem [resolvable:$true] %s32_s22  ;;  %s1797_s24 = int_to_ptr.vmem [resolvable:$true] %s20_s24 }
   0x5   :  { %s1631_s27 = scalar_lea.hbm %s2019_s1, 256 }
   0x6   :  { %p1632_p0 = scmp.ne.s32.totalorder %s2019_s1, %s1631_s27  ;;  %p1635_p1 = scmp.lt.u32.totalorder %s1631_s27, %s2019_s1 }
   0x8   :  { %p1637_p2 = pnand %p1635_p1, %p1632_p0 }
   0xa   :  { %1640 = shalt.err (!%p1637_p2)
}
   0xb   :  { %s1641_s8 = scalar_lea.vmem %s33_s22, 256  ;;  %p1646_p4 = scmp.lt.s32.totalorder %s33_s22, %s33_s22 }
   0xc   :  { %p1642_p3 = scmp.ne.s32.totalorder %s33_s22, %s1641_s8  ;;  %p1647_p5 = scmp.lt.s32.totalorder %s1641_s8, %s1641_s8 }
   0xe   :  { %p1648_p6 = por %p1647_p5, %p1646_p4 }
  0x10   :  { %p1649_p7 = pnand %p1648_p6, %p1642_p3 }
  0x12   :  { %1652 = shalt.err (!%p1649_p7)
}
  0x13   :  { %s1751_s9 = smov 128   ;;  %s1752_s10 = smov 8  }
  0x14   :  { %38 = dma.hbm_to_vmem [thread:$0]  %s2019_s1, 256, %s33_s22, [#allocation6], %s1751_s9, %s1751_s9, %s1752_s10  }
  0x15   :  { %s1653_s15 = scalar_lea.hbm %s2018_s0, 256 }
  0x16   :  { %p1654_p8 = scmp.ne.s32.totalorder %s2018_s0, %s1653_s15  ;;  %p1657_p9 = scmp.lt.u32.totalorder %s1653_s15, %s2018_s0 }
  0x18   :  { %p1659_p10 = pnand %p1657_p9, %p1654_p8 }
  0x1a   :  { %1662 = shalt.err (!%p1659_p10)
}
  0x1b   :  { %s1663_s20 = scalar_lea.vmem %s1797_s24, 256  ;;  %p1668_p12 = scmp.lt.s32.totalorder %s1797_s24, %s1797_s24 }
  0x1c   :  { %p1664_p11 = scmp.ne.s32.totalorder %s1797_s24, %s1663_s20  ;;  %p1669_p13 = scmp.lt.s32.totalorder %s1663_s20, %s1663_s20 }
  0x1e   :  { %p1670_p0 = por %p1669_p13, %p1668_p12 }
  0x20   :  { %p1671_p1 = pnand %p1670_p0, %p1664_p11 }
  0x22   :  { %1674 = shalt.err (!%p1671_p1)
}
  0x23   :  { %26 = dma.hbm_to_vmem [thread:$0]  %s2018_s0, 256, %s1797_s24, [#allocation3], %s1751_s9, %s1751_s9, %s1752_s10  }
  0x24   :  { %s1753_s22 = smov [#allocation7]   ;;  %s1754_s25 = smov [#allocation8]  }
  0x25   :  { %s44_s23 = sshll.u32 %s1753_s22, 4  ;;  %s58_s26 = sshll.u32 %s1754_s25, 4  ;;  %s45_s23 = int_to_ptr.vmem [resolvable:$true] %s44_s23  ;;  %s1834_s26 = int_to_ptr.vmem [resolvable:$true] %s58_s26 }
  0x26   :  { %s1675_s29 = scalar_lea.hbm %s2020_s2, 512 }
  0x27   :  { %p1676_p2 = scmp.ne.s32.totalorder %s2020_s2, %s1675_s29  ;;  %p1679_p3 = scmp.lt.u32.totalorder %s1675_s29, %s2020_s2 }
  0x29   :  { %p1681_p4 = pnand %p1679_p3, %p1676_p2 }
  0x2b   :  { %1684 = shalt.err (!%p1681_p4)
}
  0x2c   :  { %s1685_s0 = scalar_lea.vmem %s45_s23, 512  ;;  %p1690_p6 = scmp.lt.s32.totalorder %s45_s23, %s45_s23 }
  0x2d   :  { %p1686_p5 = scmp.ne.s32.totalorder %s45_s23, %s1685_s0  ;;  %p1691_p7 = scmp.lt.s32.totalorder %s1685_s0, %s1685_s0 }
  0x2f   :  { %p1692_p8 = por %p1691_p7, %p1690_p6 }
  0x31   :  { %p1693_p9 = pnand %p1692_p8, %p1686_p5 }
  0x33   :  { %1696 = shalt.err (!%p1693_p9)
}
  0x34   :  { %50 = dma.hbm_to_vmem [thread:$0]  %s2020_s2, 512, %s45_s23, [#allocation6], %s1751_s9, %s1751_s9, %s1752_s10  }
  0x35   :  { %s1697_s15 = scalar_lea.hbm %s2022_s4, 512 }
  0x36   :  { %p1698_p10 = scmp.ne.s32.totalorder %s2022_s4, %s1697_s15  ;;  %p1701_p11 = scmp.lt.u32.totalorder %s1697_s15, %s2022_s4 }
  0x38   :  { %p1703_p12 = pnand %p1701_p11, %p1698_p10 }
  0x3a   :  { %1706 = shalt.err (!%p1703_p12)
}
  0x3b   :  { %s1707_s20 = scalar_lea.vmem %s1834_s26, 512  ;;  %p1712_p0 = scmp.lt.s32.totalorder %s1834_s26, %s1834_s26 }
  0x3c   :  { %p1708_p13 = scmp.ne.s32.totalorder %s1834_s26, %s1707_s20  ;;  %p1713_p1 = scmp.lt.s32.totalorder %s1707_s20, %s1707_s20 }
  0x3e   :  { %p1714_p2 = por %p1713_p1, %p1712_p0 }
  0x40   :  { %p1715_p3 = pnand %p1714_p2, %p1708_p13 }
  0x42   :  { %1718 = shalt.err (!%p1715_p3)
}
  0x43   :  { %64 = dma.hbm_to_vmem [thread:$0]  %s2022_s4, 512, %s1834_s26, [#allocation9], %s1751_s9, %s1751_s9, %s1752_s10  }
  0x44   :  { %1741 = dma.done.wait [#allocation3], 256  }
  0x45   :  { %1742 = vsyncadd [#allocation3], 4294967040 }
  0x46   :  { %1743 = dma.done.wait [#allocation6], 768  }
  0x47   :  { %1744 = vsyncadd [#allocation6], 4294966528 }
  0x48   :  { %1745 = dma.done.wait [#allocation9], 512  }
  0x49   :  { %1746 = vsyncadd [#allocation9], 4294966784  ;;  %v1755_v0 = vmov 0.0|0.0   ;;  %vm1756_vm0 = vmmov 0   ;;  %v1757_v1 = vmov 0.0   ;;  %v79_v2 = vld [vmem:[#allocation5] sm:$0xff]  ;;  %v240_v15 = vlaneseq }
  0x4a   :  { %1494 = vmatprep.subr.bf16.mxu1 %v1755_v0  ;;  %1385 = vmatprep.mubr.msk.f32.mxu1 %vm1756_vm0, %v1757_v1  ;;  %v80_v3 = vld [vmem:[#allocation5 + $0x8] sm:$0xff]  ;;  %v81_v5 = vld [vmem:[#allocation7] sm:$0xff]  ;;  %v82_v6 = vld [vmem:[#allocation7 + $0x8] sm:$0xff]  ;;  %vm86_vm1 = vcmask 130048   ;;  %v1758_v13 = vmov 1966171168  }
  0x4b   :  { %1500 = vmatprep.subr.bf16.mxu0 %v1755_v0  ;;  %1403 = vmatprep.mubr.msk.f32.mxu0 %vm1756_vm0, %v1757_v1  ;;  %v1495_v4 = vpack.c.bf16 %v80_v3, %v79_v2  ;;  %v1877_v7 = vpack.c.bf16 %v82_v6, %v81_v5  ;;  %v83_v8 = vld [vmem:[#allocation7 + $0x10] sm:$0xff]  ;;  %v84_v9 = vld [vmem:[#allocation7 + $0x18] sm:$0xff]  ;;  %v85_v10 = vld [vmem:[#allocation2] sm:$0xff]  ;;  %v238_v14 = vunpack.c.l.s4 %v1758_v13  ;;  %v241_v17 = vshrl.u32 %v240_v15, 7  ;;  %s1760_s10 = smov 64   ;;  %s1761_s23 = smov [#allocation10]  }
  0x4c   :  { %v1881_v11 = vpack.c.bf16 %v84_v9, %v83_v8  ;;  %v161_v12 = vld [vmem:[#allocation2 + $0x8] sm:$0xff]  ;;  %vm383_vm2 = vcmask 1040384   ;;  %v1312_v48 = vld [vmem:[%s2021_s3] ss:$0 sm:$0xff]  ;;  %s1759_s3 = smov 32   ;;  %vm407_vm3 = vcmask 261120  }
  0x4d   :  { %1496 = vmatpush3.bf16.msra.mxu1 %v1495_v4  ;;  %1502 = vmatpush3.bf16.msra.mxu0 %v1877_v7  ;;  %v239_v16 = vunpack.c.0.s8 %v238_v14  ;;  %v345_v36 = vsub.s32 0, %v241_v17  ;;  %s1299_s25 = sshll.u32 %s1761_s23, 4  ;;  %s1300_s25 = int_to_ptr.vmem [resolvable:$true] %s1299_s25 }
  0x4e   :  { %1497 = vmatprep.subr.bf16.mxu1 %v1755_v0  ;;  %1503 = vmatprep.subr.bf16.mxu0 %v1755_v0  ;;  %s1719_s26 = scalar_lea.vmem %s1300_s25, 32  ;;  %p1724_p5 = scmp.lt.s32.totalorder %s1300_s25, %s1300_s25 }
  0x4f   :  { %v242_v18 = vsub.s32 %v239_v16, %v241_v17  ;;  %p1720_p4 = scmp.ne.s32.totalorder %s1300_s25, %s1719_s26  ;;  %p1725_p6 = scmp.lt.s32.totalorder %s1719_s26, %s1719_s26 }
  0x50   :  { %1386 = vmatmul.mubr.msk.f32.vlgmr.msra.gmra.mrb[0].mxu1 %vm86_vm1, %v85_v10 }
  0x51   :  { %1499 = vmatpush3.bf16.msra.mxu1 %v1495_v4  ;;  %1392 = vmatprep.mubr.msk.f32.mxu1 %vm1756_vm0, %v1757_v1  ;;  %p1726_p7 = por %p1725_p6, %p1724_p5 }
  0x52   :  { %1505 = vmatpush3.bf16.msra.mxu0 %v1881_v11  ;;  %1506 = vmatprep.subr.bf16.mxu1 %v1755_v0 }
  0x53   :  { %1512 = vmatprep.subr.bf16.mxu0 %v1755_v0  ;;  %p1727_p8 = pnand %p1726_p7, %p1720_p4 }
  0x54   :  { %1393 = vmatmul.mubr.msk.f32.vlgmr.msra.gmra.mrb[2].mxu1 %vm86_vm1, %v161_v12 }
  0x55   :  { %1404 = vmatmul.mubr.f32.vlgmr.msra.gmra.mrb[0].mxu0 %v1757_v1  ;;  %1508 = vmatpush3.bf16.msra.mxu1 %v1877_v7 }
  0x56   :  { %1509 = vmatprep.subr.bf16.mxu1 %v1755_v0  ;;  %1414 = vmatprep.mubr.msk.f32.mxu1 %vm1756_vm0, %v1757_v1 }
  0x57   :  { %1514 = vmatpush3.bf16.msra.mxu0 %v1877_v7  ;;  %1425 = vmatprep.mubr.msk.f32.mxu0 %vm1756_vm0, %v1757_v1 }
  0x58   :  { %1515 = vmatprep.subr.bf16.mxu0 %v1755_v0 }
  0x59   :  { %1511 = vmatpush3.bf16.msra.mxu1 %v1881_v11 }
  0x5a   :  { %1518 = vmatprep.subr.bf16.mxu1 %v1755_v0 }
  0x5b   :  { %1517 = vmatpush3.bf16.msra.mxu0 %v1881_v11 }
  0x5c   :  { %1524 = vmatprep.subr.bf16.mxu0 %v1755_v0 }
 0x123   :  { %v156_v19 = vpop.f32.mrb[0].mxu1 }
 0x124   :  { %v236_v20 = vcombine.high %v156_v19, %v156_v19  ;;  %v243_v21 = vrot.slane %v156_v19, %v242_v18  ;;  %v1387_v22 = vpop.f32.mrb[1].mxu1 }
 0x126   :  { %v250_v23 = vrot.slane %v236_v20, %v242_v18  ;;  %v251_v24 = vcombine.high %v243_v21, %v243_v21  ;;  %v259_v34 = vrot.slane %v243_v21, %v242_v18 }
 0x127   :  { %v231_v25 = vpop.f32.mrb[2].mxu1 }
 0x128   :  { %v252_v26 = vcombine.high %v250_v23, %v250_v23  ;;  %v266_v27 = vrot.slane %v250_v23, %v242_v18  ;;  %v273_v28 = vrot.slane %v251_v24, %v242_v18  ;;  %v1394_v29 = vpop.f32.mrb[3].mxu1  ;;  %v477_v30 = vpop.f32.mrb[0].mxu0  ;;  %v294_v31 = vcombine.high %v231_v25, %v231_v25 }
 0x129   :  { %v301_v32 = vrot.slane %v231_v25, %v242_v18  ;;  %v1405_v33 = vpop.f32.mrb[1].mxu0  ;;  %v281_v44 = vcombine.high %v259_v34, %v259_v34 }
 0x12a   :  { %v280_v35 = vrot.slane %v252_v26, %v242_v18  ;;  %v308_v37 = vrot.slane %v294_v31, %v242_v18  ;;  %v282_v45 = vcombine.high %v266_v27, %v266_v27  ;;  %v283_v46 = vcombine.high %v273_v28, %v273_v28 }
 0x12b   :  { %v309_v38 = vcombine.high %v301_v32, %v301_v32  ;;  %v317_v39 = vrot.slane %v301_v32, %v242_v18 }
 0x12c   :  { %v310_v40 = vcombine.high %v308_v37, %v308_v37  ;;  %v324_v41 = vrot.slane %v308_v37, %v242_v18  ;;  %v284_v52 = vcombine.high %v280_v35, %v280_v35 }
 0x12d   :  { %v331_v42 = vrot.slane %v309_v38, %v242_v18  ;;  %v339_v43 = vcombine.high %v317_v39, %v317_v39  ;;  %v346_v47 = vrot.slane %v317_v39, %v345_v36 }
 0x12e   :  { %v338_v49 = vrot.slane %v310_v40, %v242_v18  ;;  %v340_v53 = vcombine.high %v324_v41, %v324_v41  ;;  %v362_v55 = vrot.slane %v324_v41, %v345_v36 }
 0x12f   :  { %v341_v50 = vcombine.high %v331_v42, %v331_v42  ;;  %v350_v51 = vrot.slane %v331_v42, %v345_v36  ;;  %v354_v54 = vrot.slane %v339_v43, %v345_v36  ;;  %v384_v56 = vsel %vm383_vm2, %v259_v34, %v346_v47 }
 0x130   :  { %v342_v57 = vcombine.high %v338_v49, %v338_v49  ;;  %v399_v58 = vadd.f32 %v1312_v48, %v384_v56  ;;  %v388_v63 = vsel %vm383_vm2, %v266_v27, %v362_v55  ;;  %v366_v2 = vrot.slane %v338_v49, %v345_v36 }
 0x131   :  { %v385_v59 = vsel %vm383_vm2, %v273_v28, %v350_v51  ;;  %v358_v60 = vrot.slane %v341_v50, %v345_v36  ;;  %v386_v62 = vsel %vm383_vm2, %v281_v44, %v354_v54  ;;  %v1912_v6 = vadd.f32 %v1312_v48, %v388_v63 }
 0x132   :  { %v400_v61 = vadd.f32 %v1312_v48, %v385_v59  ;;  %v481_v3 = vadd.f32 %v477_v30, %v399_v58  ;;  %v1909_v4 = vadd.f32 %v1312_v48, %v386_v62  ;;  %v389_v9 = vsel %vm383_vm2, %v280_v35, %v366_v2 }
 0x133   :  { %v387_v5 = vsel %vm383_vm2, %v283_v46, %v358_v60  ;;  %v370_v10 = vrot.slane %v340_v53, %v345_v36  ;;  %v374_v12 = vrot.slane %v342_v57, %v345_v36  ;;  %v1917_v13 = vadd.f32 %v1312_v48, %v389_v9 }
 0x134   :  { %v1914_v8 = vadd.f32 %v1312_v48, %v387_v5  ;;  %1567 = vtanh.f32 %v481_v3  ;;  %v1313_v19 = vmul.f32 -1.442695, %v481_v3 }
 0x135   :  { %v390_v14 = vsel %vm383_vm2, %v282_v45, %v370_v10  ;;  %v391_v15 = vsel %vm383_vm2, %v284_v52, %v374_v12 }
 0x136   :  { %v1921_v16 = vadd.f32 %v1312_v48, %v390_v14  ;;  %v1923_v17 = vadd.f32 %v1312_v48, %v391_v15  ;;  %1569 = vpow2.f32 %v1313_v19 }
 0x13e   :  { %v1568_v18 = vpop.eup %1567 }
 0x13f   :  { %491 = vrot.lane.b32.xlu0 %v1568_v18, %s1759_s3 }
 0x140   :  { %v1570_v20 = vpop.eup %1569 }
 0x141   :  { %v485_v21 = vadd.f32 1.0, %v1570_v20 }
 0x143   :  { %1571 = vrcp.f32 %v485_v21 }
 0x14d   :  { %v1572_v22 = vpop.eup %1571 }
 0x14e   :  { %v489_v25 = vmul.f32 0.0, %v1572_v22 }
 0x1b1   :  { %v492_v23 = vpop.permute.xlu0 %491 }
 0x1b2   :  { %v494_v24 = vmul.f32 %v1572_v22, %v492_v23 }
 0x1b4   :  { %496 = vrot.lane.b32.xlu0 %v494_v24, %s1759_s3 }
 0x226   :  { %v497_v26 = vpop.permute.xlu0 %496 }
 0x227   :  { %v499_v27 = vadd.f32 %v497_v26, %v489_v25 }
 0x229   :  { %1573 = vtanh.f32 %v499_v27 }
 0x233   :  { %v1574_v28 = vpop.eup %1573 }
 0x234   :  { %502 = vrot.lane.b32.xlu1 %v1574_v28, %s1759_s3 }
 0x2a6   :  { %v503_v29 = vpop.permute.xlu1 %502 }
 0x2a7   :  { %v505_v30 = vmul.f32 %v1572_v22, %v503_v29 }
 0x2a9   :  { %507 = vrot.lane.b32.xlu1 %v505_v30, %s1760_s10 }
 0x31b   :  { %v508_v31 = vpop.permute.xlu1 %507 }
 0x31c   :  { %1415 = vmatmul.mubr.msk.f32.vlgmr.msra.gmra.mrb[4].mxu1 %vm407_vm3, %v508_v31 }
 0x31d   :  { %1520 = vmatpush3.bf16.msra.mxu1 %v1877_v7  ;;  %1436 = vmatprep.mubr.msk.f32.mxu1 %vm1756_vm0, %v1757_v1 }
 0x31e   :  { %1521 = vmatprep.subr.bf16.mxu1 %v1755_v0 }
 0x321   :  { %1523 = vmatpush3.bf16.msra.mxu1 %v1881_v11 }
 0x322   :  { %1530 = vmatprep.subr.bf16.mxu1 %v1755_v0 }
 0x3ef   :  { %v577_v32 = vpop.f32.mrb[4].mxu1 }
 0x3f0   :  { %v581_v33 = vadd.f32 %v577_v32, %v400_v61  ;;  %v1416_v34 = vpop.f32.mrb[5].mxu1 }
 0x3f2   :  { %1575 = vtanh.f32 %v581_v33  ;;  %v1315_v36 = vmul.f32 -1.442695, %v581_v33 }
 0x3f4   :  { %1577 = vpow2.f32 %v1315_v36 }
 0x3fc   :  { %v1576_v35 = vpop.eup %1575 }
 0x3fd   :  { %591 = vrot.lane.b32.xlu0 %v1576_v35, %s1759_s3 }
 0x3fe   :  { %v1578_v37 = vpop.eup %1577 }
 0x3ff   :  { %v585_v38 = vadd.f32 1.0, %v1578_v37 }
 0x401   :  { %1579 = vrcp.f32 %v585_v38 }
 0x40b   :  { %v1580_v39 = vpop.eup %1579 }
 0x40c   :  { %v589_v42 = vmul.f32 %v1580_v39, %v499_v27 }
 0x46f   :  { %v592_v40 = vpop.permute.xlu0 %591 }
 0x470   :  { %v594_v41 = vmul.f32 %v1580_v39, %v592_v40 }
 0x472   :  { %596 = vrot.lane.b32.xlu1 %v594_v41, %s1759_s3 }
 0x4e4   :  { %v597_v43 = vpop.permute.xlu1 %596 }
 0x4e5   :  { %v599_v44 = vadd.f32 %v597_v43, %v589_v42 }
 0x4e7   :  { %1581 = vtanh.f32 %v599_v44 }
 0x4f1   :  { %v1582_v45 = vpop.eup %1581 }
 0x4f2   :  { %602 = vrot.lane.b32.xlu0 %v1582_v45, %s1759_s3 }
 0x564   :  { %v603_v46 = vpop.permute.xlu0 %602 }
 0x565   :  { %v605_v47 = vmul.f32 %v1580_v39, %v603_v46 }
 0x567   :  { %607 = vrot.lane.b32.xlu1 %v605_v47, %s1760_s10 }
 0x5d9   :  { %v608_v48 = vpop.permute.xlu1 %607 }
 0x5da   :  { %1426 = vmatmul.mubr.msk.f32.vlgmr.msra.gmra.mrb[2].mxu0 %vm407_vm3, %v608_v48 }
 0x5db   :  { %1526 = vmatpush3.bf16.msra.mxu0 %v1877_v7  ;;  %1447 = vmatprep.mubr.msk.f32.mxu0 %vm1756_vm0, %v1757_v1 }
 0x5dc   :  { %1527 = vmatprep.subr.bf16.mxu0 %v1755_v0 }
 0x5df   :  { %1529 = vmatpush3.bf16.msra.mxu0 %v1881_v11 }
 0x5e0   :  { %1536 = vmatprep.subr.bf16.mxu0 %v1755_v0 }
 0x6ad   :  { %v677_v49 = vpop.f32.mrb[2].mxu0 }
 0x6ae   :  { %v681_v50 = vadd.f32 %v677_v49, %v1909_v4  ;;  %v1427_v51 = vpop.f32.mrb[3].mxu0 }
 0x6b0   :  { %1583 = vtanh.f32 %v681_v50  ;;  %v1317_v53 = vmul.f32 -1.442695, %v681_v50 }
 0x6b2   :  { %1585 = vpow2.f32 %v1317_v53 }
 0x6ba   :  { %v1584_v52 = vpop.eup %1583 }
 0x6bb   :  { %691 = vrot.lane.b32.xlu0 %v1584_v52, %s1759_s3 }
 0x6bc   :  { %v1586_v54 = vpop.eup %1585 }
 0x6bd   :  { %v685_v55 = vadd.f32 1.0, %v1586_v54 }
 0x6bf   :  { %1587 = vrcp.f32 %v685_v55 }
 0x6c9   :  { %v1588_v56 = vpop.eup %1587 }
 0x6ca   :  { %v689_v59 = vmul.f32 %v1588_v56, %v599_v44 }
 0x72d   :  { %v692_v57 = vpop.permute.xlu0 %691 }
 0x72e   :  { %v694_v58 = vmul.f32 %v1588_v56, %v692_v57 }
 0x730   :  { %696 = vrot.lane.b32.xlu1 %v694_v58, %s1759_s3 }
 0x7a2   :  { %v697_v60 = vpop.permute.xlu1 %696 }
 0x7a3   :  { %v699_v61 = vadd.f32 %v697_v60, %v689_v59 }
 0x7a5   :  { %1589 = vtanh.f32 %v699_v61 }
 0x7af   :  { %v1590_v62 = vpop.eup %1589 }
 0x7b0   :  { %702 = vrot.lane.b32.xlu0 %v1590_v62, %s1759_s3 }
 0x822   :  { %v703_v63 = vpop.permute.xlu0 %702 }
 0x823   :  { %v705_v2 = vmul.f32 %v1588_v56, %v703_v63 }
 0x825   :  { %707 = vrot.lane.b32.xlu1 %v705_v2, %s1760_s10 }
 0x897   :  { %v708_v3 = vpop.permute.xlu1 %707 }
 0x898   :  { %1437 = vmatmul.mubr.msk.f32.vlgmr.msra.gmra.mrb[6].mxu1 %vm407_vm3, %v708_v3 }
 0x899   :  { %1532 = vmatpush3.bf16.msra.mxu1 %v1877_v7  ;;  %1458 = vmatprep.mubr.msk.f32.mxu1 %vm1756_vm0, %v1757_v1 }
 0x89a   :  { %1533 = vmatprep.subr.bf16.mxu1 %v1755_v0 }
 0x89d   :  { %1535 = vmatpush3.bf16.msra.mxu1 %v1881_v11 }
 0x89e   :  { %1542 = vmatprep.subr.bf16.mxu1 %v1755_v0 }
 0x96b   :  { %v777_v4 = vpop.f32.mrb[6].mxu1 }
 0x96c   :  { %v781_v5 = vadd.f32 %v777_v4, %v1914_v8  ;;  %v1438_v9 = vpop.f32.mrb[7].mxu1 }
 0x96e   :  { %1591 = vtanh.f32 %v781_v5  ;;  %v1319_v12 = vmul.f32 -1.442695, %v781_v5 }
 0x970   :  { %1593 = vpow2.f32 %v1319_v12 }
 0x978   :  { %v1592_v10 = vpop.eup %1591 }
 0x979   :  { %791 = vrot.lane.b32.xlu0 %v1592_v10, %s1759_s3 }
 0x97a   :  { %v1594_v14 = vpop.eup %1593 }
 0x97b   :  { %v785_v15 = vadd.f32 1.0, %v1594_v14 }
 0x97d   :  { %1595 = vrcp.f32 %v785_v15 }
 0x987   :  { %v1596_v18 = vpop.eup %1595 }
 0x988   :  { %v789_v21 = vmul.f32 %v1596_v18, %v699_v61 }
 0x9eb   :  { %v792_v19 = vpop.permute.xlu0 %791 }
 0x9ec   :  { %v794_v20 = vmul.f32 %v1596_v18, %v792_v19 }
 0x9ee   :  { %796 = vrot.lane.b32.xlu1 %v794_v20, %s1759_s3 }
 0xa60   :  { %v797_v22 = vpop.permute.xlu1 %796 }
 0xa61   :  { %v799_v23 = vadd.f32 %v797_v22, %v789_v21 }
 0xa63   :  { %1597 = vtanh.f32 %v799_v23 }
 0xa6d   :  { %v1598_v8 = vpop.eup %1597 }
 0xa6e   :  { %802 = vrot.lane.b32.xlu0 %v1598_v8, %s1759_s3 }
 0xae0   :  { %v803_v24 = vpop.permute.xlu0 %802 }
 0xae1   :  { %v805_v25 = vmul.f32 %v1596_v18, %v803_v24 }
 0xae3   :  { %807 = vrot.lane.b32.xlu1 %v805_v25, %s1760_s10 }
 0xb55   :  { %v808_v26 = vpop.permute.xlu1 %807 }
 0xb56   :  { %1448 = vmatmul.mubr.msk.f32.vlgmr.msra.gmra.mrb[4].mxu0 %vm407_vm3, %v808_v26 }
 0xb57   :  { %1538 = vmatpush3.bf16.msra.mxu0 %v1877_v7  ;;  %1469 = vmatprep.mubr.msk.f32.mxu0 %vm1756_vm0, %v1757_v1 }
 0xb58   :  { %1539 = vmatprep.subr.bf16.mxu0 %v1755_v0 }
 0xb5b   :  { %1541 = vmatpush3.bf16.msra.mxu0 %v1881_v11 }
 0xb5c   :  { %1548 = vmatprep.subr.bf16.mxu0 %v1755_v0 }
 0xc29   :  { %v877_v27 = vpop.f32.mrb[4].mxu0 }
 0xc2a   :  { %v881_v28 = vadd.f32 %v877_v27, %v1912_v6  ;;  %v1449_v29 = vpop.f32.mrb[5].mxu0 }
 0xc2b   :  { %v1207_v29 = vld [vmem:[#allocation8 + $0x8] sm:$0xff] }
 0xc2c   :  { %1599 = vtanh.f32 %v881_v28  ;;  %v1321_v31 = vmul.f32 -1.442695, %v881_v28 }
 0xc2e   :  { %1601 = vpow2.f32 %v1321_v31 }
 0xc36   :  { %v1600_v30 = vpop.eup %1599 }
 0xc37   :  { %891 = vrot.lane.b32.xlu0 %v1600_v30, %s1759_s3  ;;  %v1208_v30 = vld [vmem:[#allocation8 + $0x10] sm:$0xff] }
 0xc38   :  { %v1602_v32 = vpop.eup %1601 }
 0xc39   :  { %v885_v33 = vadd.f32 1.0, %v1602_v32  ;;  %v1209_v32 = vld [vmem:[#allocation8 + $0x18] sm:$0xff] }
 0xc3b   :  { %1603 = vrcp.f32 %v885_v33  ;;  %v1552_v33 = vpack.c.bf16 %v1209_v32, %v1208_v30 }
 0xc45   :  { %v1604_v34 = vpop.eup %1603 }
 0xc46   :  { %v889_v37 = vmul.f32 %v1604_v34, %v799_v23 }
 0xca9   :  { %v892_v35 = vpop.permute.xlu0 %891 }
 0xcaa   :  { %v894_v36 = vmul.f32 %v1604_v34, %v892_v35 }
 0xcac   :  { %896 = vrot.lane.b32.xlu1 %v894_v36, %s1759_s3 }
 0xd1e   :  { %v897_v38 = vpop.permute.xlu1 %896 }
 0xd1f   :  { %v899_v39 = vadd.f32 %v897_v38, %v889_v37  ;;  %v1328_v38 = vld [vmem:[%s2023_s5] ss:$0 sm:$0xff] }
 0xd21   :  { %1605 = vtanh.f32 %v899_v39 }
 0xd2b   :  { %v1606_v6 = vpop.eup %1605 }
 0xd2c   :  { %902 = vrot.lane.b32.xlu0 %v1606_v6, %s1759_s3 }
 0xd9e   :  { %v903_v40 = vpop.permute.xlu0 %902 }
 0xd9f   :  { %v905_v41 = vmul.f32 %v1604_v34, %v903_v40 }
 0xda1   :  { %907 = vrot.lane.b32.xlu1 %v905_v41, %s1760_s10 }
 0xe13   :  { %v908_v42 = vpop.permute.xlu1 %907 }
 0xe14   :  { %1459 = vmatmul.mubr.msk.f32.vlgmr.msra.gmra.mrb[8].mxu1 %vm407_vm3, %v908_v42 }
 0xe15   :  { %1544 = vmatpush3.bf16.msra.mxu1 %v1877_v7  ;;  %1480 = vmatprep.mubr.msk.f32.mxu1 %vm1756_vm0, %v1757_v1 }
 0xe16   :  { %1545 = vmatprep.subr.bf16.mxu1 %v1755_v0 }
 0xe19   :  { %1547 = vmatpush3.bf16.msra.mxu1 %v1881_v11 }
 0xee7   :  { %v977_v43 = vpop.f32.mrb[8].mxu1 }
 0xee8   :  { %v981_v44 = vadd.f32 %v977_v43, %v1917_v13  ;;  %v1460_v45 = vpop.f32.mrb[9].mxu1 }
 0xeea   :  { %1607 = vtanh.f32 %v981_v44  ;;  %v1323_v47 = vmul.f32 -1.442695, %v981_v44 }
 0xeec   :  { %1609 = vpow2.f32 %v1323_v47 }
 0xef4   :  { %v1608_v46 = vpop.eup %1607 }
 0xef5   :  { %991 = vrot.lane.b32.xlu0 %v1608_v46, %s1759_s3 }
 0xef6   :  { %v1610_v48 = vpop.eup %1609 }
 0xef7   :  { %v985_v49 = vadd.f32 1.0, %v1610_v48 }
 0xef9   :  { %1611 = vrcp.f32 %v985_v49 }
 0xf03   :  { %v1612_v7 = vpop.eup %1611 }
 0xf04   :  { %v989_v52 = vmul.f32 %v1612_v7, %v899_v39 }
 0xf67   :  { %v992_v50 = vpop.permute.xlu0 %991 }
 0xf68   :  { %v994_v51 = vmul.f32 %v1612_v7, %v992_v50 }
 0xf6a   :  { %996 = vrot.lane.b32.xlu1 %v994_v51, %s1759_s3 }
 0xfdc   :  { %v997_v11 = vpop.permute.xlu1 %996 }
 0xfdd   :  { %v999_v53 = vadd.f32 %v997_v11, %v989_v52 }
 0xfdf   :  { %1613 = vtanh.f32 %v999_v53 }
 0xfe9   :  { %v1614_v13 = vpop.eup %1613 }
 0xfea   :  { %1002 = vrot.lane.b32.xlu0 %v1614_v13, %s1759_s3 }
0x105c   :  { %v1003_v54 = vpop.permute.xlu0 %1002 }
0x105d   :  { %v1005_v55 = vmul.f32 %v1612_v7, %v1003_v54 }
0x105f   :  { %1007 = vrot.lane.b32.xlu1 %v1005_v55, %s1760_s10 }
0x10d1   :  { %v1008_v56 = vpop.permute.xlu1 %1007 }
0x10d2   :  { %1470 = vmatmul.mubr.msk.f32.vlgmr.msra.gmra.mrb[6].mxu0 %vm407_vm3, %v1008_v56 }
0x10d3   :  { %1491 = vmatprep.mubr.msk.f32.mxu0 %vm1756_vm0, %v1757_v1 }
0x11a5   :  { %v1077_v57 = vpop.f32.mrb[6].mxu0 }
0x11a6   :  { %v1081_v58 = vadd.f32 %v1077_v57, %v1921_v16  ;;  %v1471_v59 = vpop.f32.mrb[7].mxu0 }
0x11a8   :  { %1615 = vtanh.f32 %v1081_v58  ;;  %v1325_v61 = vmul.f32 -1.442695, %v1081_v58 }
0x11aa   :  { %1617 = vpow2.f32 %v1325_v61 }
0x11b2   :  { %v1616_v60 = vpop.eup %1615 }
0x11b3   :  { %1091 = vrot.lane.b32.xlu0 %v1616_v60, %s1759_s3 }
0x11b4   :  { %v1618_v62 = vpop.eup %1617 }
0x11b5   :  { %v1085_v63 = vadd.f32 1.0, %v1618_v62 }
0x11b7   :  { %1619 = vrcp.f32 %v1085_v63 }
0x11c1   :  { %v1620_v2 = vpop.eup %1619 }
0x11c2   :  { %v1089_v5 = vmul.f32 %v1620_v2, %v999_v53 }
0x1225   :  { %v1092_v3 = vpop.permute.xlu0 %1091 }
0x1226   :  { %v1094_v4 = vmul.f32 %v1620_v2, %v1092_v3 }
0x1228   :  { %1096 = vrot.lane.b32.xlu1 %v1094_v4, %s1759_s3 }
0x129a   :  { %v1097_v1 = vpop.permute.xlu1 %1096 }
0x129b   :  { %v1099_v9 = vadd.f32 %v1097_v1, %v1089_v5 }
0x129d   :  { %1621 = vtanh.f32 %v1099_v9 }
0x12a7   :  { %v1622_v16 = vpop.eup %1621 }
0x12a8   :  { %1102 = vrot.lane.b32.xlu0 %v1622_v16, %s1759_s3 }
0x131a   :  { %v1103_v10 = vpop.permute.xlu0 %1102 }
0x131b   :  { %v1105_v12 = vmul.f32 %v1620_v2, %v1103_v10 }
0x131d   :  { %1107 = vrot.lane.b32.xlu1 %v1105_v12, %s1760_s10 }
0x138f   :  { %v1108_v14 = vpop.permute.xlu1 %1107 }
0x1390   :  { %1481 = vmatmul.mubr.msk.f32.vlgmr.msra.gmra.mrb[10].mxu1 %vm407_vm3, %v1108_v14 }
0x1463   :  { %v1177_v15 = vpop.f32.mrb[10].mxu1 }
0x1464   :  { %v1181_v18 = vadd.f32 %v1177_v15, %v1923_v17  ;;  %v1482_v19 = vpop.f32.mrb[11].mxu1  ;;  %v1206_v17 = vld [vmem:[#allocation8] sm:$0xff] }
0x1465   :  { %v1549_v31 = vpack.c.bf16 %v1207_v29, %v1206_v17 }
0x1466   :  { %1623 = vtanh.f32 %v1181_v18  ;;  %v1327_v21 = vmul.f32 -1.442695, %v1181_v18 }
0x1467   :  { %1550 = vmatpush3.bf16.msra.mxu0 %v1549_v31 }
0x1468   :  { %1625 = vpow2.f32 %v1327_v21  ;;  %1551 = vmatprep.subr.bf16.mxu0 %v1755_v0 }
0x146b   :  { %1553 = vmatpush3.bf16.msra.mxu0 %v1552_v33 }
0x1470   :  { %v1624_v20 = vpop.eup %1623 }
0x1471   :  { %1191 = vrot.lane.b32.xlu0 %v1624_v20, %s1759_s3 }
0x1472   :  { %v1626_v22 = vpop.eup %1625 }
0x1473   :  { %v1185_v23 = vadd.f32 1.0, %v1626_v22 }
0x1475   :  { %1627 = vrcp.f32 %v1185_v23 }
0x147f   :  { %v1628_v8 = vpop.eup %1627 }
0x1480   :  { %v1189_v26 = vmul.f32 %v1628_v8, %v1099_v9 }
0x14e3   :  { %v1192_v24 = vpop.permute.xlu0 %1191 }
0x14e4   :  { %v1194_v25 = vmul.f32 %v1628_v8, %v1192_v24 }
0x14e6   :  { %1196 = vrot.lane.b32.xlu1 %v1194_v25, %s1759_s3 }
0x1558   :  { %v1197_v27 = vpop.permute.xlu1 %1196 }
0x1559   :  { %v1199_v28 = vadd.f32 %v1197_v27, %v1189_v26 }
0x155b   :  { %1629 = vtanh.f32 %v1199_v28 }
0x1565   :  { %v1630_v34 = vpop.eup %1629 }
0x1566   :  { %1202 = vrot.lane.b32.xlu0 %v1630_v34, %s1759_s3 }
0x15d8   :  { %v1203_v35 = vpop.permute.xlu0 %1202 }
0x15d9   :  { %v1205_v36 = vmul.f32 %v1628_v8, %v1203_v35 }
0x15db   :  { %1218 = vrot.lane.b32.xlu1 %v1205_v36, %s1760_s10 }
0x164d   :  { %v1219_v37 = vpop.permute.xlu1 %1218 }
0x164e   :  { %1492 = vmatmul.mubr.msk.f32.vlgmr.msra.gmra.mrb[8].mxu0 %vm407_vm3, %v1219_v37 }
0x1721   :  { %v1288_v39 = vpop.f32.mrb[8].mxu0 }
0x1722   :  { %v1289_v6 = vadd.f32 %v1328_v38, %v1288_v39  ;;  %v1493_v0 = vpop.f32.mrb[9].mxu0 }
0x1724   :  { %1292 = vst [vmem:[#allocation10] sm:$0x3] %v1289_v6 }
0x1725   :  { %1730 = shalt.err (!%p1727_p8)
}
0x1726   :  { %s1731_s29 = scalar_lea.hbm %s2024_s6, 32 }
0x1727   :  { %p1732_p9 = scmp.ne.s32.totalorder %s2024_s6, %s1731_s29  ;;  %p1735_p10 = scmp.lt.u32.totalorder %s1731_s29, %s2024_s6 }
0x1729   :  { %p1737_p11 = pnand %p1735_p10, %p1732_p9 }
0x172b   :  { %1740 = shalt.err (!%p1737_p11)
}
0x172c   :  { %1302 = dma.vmem_to_hbm [thread:$0]  %s1300_s25, 32, %s2024_s6, [#allocation4]  }
0x172d   :  { %1747 = dma.done.wait [#allocation4], 32  }
0x172e   :  { %1748 = vsyncadd [#allocation4], 4294967264 }
0x172f   :  { %1306 = vsyncpa [#allocation3], 1 }
0x1730   :  { %1307 = vsyncpa [#allocation6], 1 }
0x1731   :  { %1308 = vsyncpa [#allocation9], 1 }
0x1732   :  { %1309 = vsyncpa [#allocation4], 1 }

</bundles_post_ra>
